<compile_context>
chip_gen: v7x
topology: tpu7x:2x2x1
jax: 0.10.0
libtpu: 0.0.40
codegen_flags: <defaults>
</compile_context>

<pallas_src>
import functools

import jax
import jax.numpy as jnp
from jax import lax
from jax.experimental import pallas as pl
from jax.experimental.pallas import tpu as pltpu


def _round_up(x, m):
    return (x + m - 1) // m * m


def _mlp_kernel(x_ref, w1_ref, b1_ref, w2_ref, b2_ref, o_ref):
    # fc1: x (TM, In) . W1 (Hp, In) contracting on In -> (TM, Hp).
    # dot_general lets the MXU consume W1 in PyTorch (out, in) layout directly.
    h = lax.dot_general(
        x_ref[...], w1_ref[...],
        dimension_numbers=(((1,), (1,)), ((), ())),
        preferred_element_type=jnp.float32,
    )
    h = jnp.maximum(h + b1_ref[...], 0.0)          # bias + ReLU in f32

    # fc2: h (TM, Hp) . W2p (Op, Hp) contracting on Hp -> (TM, Op).
    # Op is padded to a multiple of 128 -> lane-dense output store.
    o = lax.dot_general(
        h.astype(w2_ref.dtype), w2_ref[...],
        dimension_numbers=(((1,), (1,)), ((), ())),
        preferred_element_type=jnp.float32,
    )
    o_ref[...] = (o + b2_ref[...]).astype(o_ref.dtype)


def prepare_params(w1, b1, w2, b2):
    """One-time parameter prep (call once at init, NOT per forward).

    Keeps nn.Linear (out_features, in_features) layout (no transpose), pads
    the hidden dim and fc2's output features up to multiples of 128 for
    MXU/lane alignment, and reshapes biases to TPU-friendly f32 2D rows.
    Returns (w1_p, b1_2d, w2_p, b2_2d, out_features).
    """
    hidden, _in_features = w1.shape
    out_features, _hidden = w2.shape

    hid_p = _round_up(hidden, 128)
    out_p = _round_up(out_features, 128)

    # Pad hidden (rows of W1, cols of W2, b1) with zeros: relu(0 + 0) = 0, and
    # the matching zero columns of W2 contribute nothing -> semantics preserved.
    w1_p = jnp.pad(w1, ((0, hid_p - hidden), (0, 0)))
    b1_2d = jnp.pad(b1, (0, hid_p - hidden)).reshape(1, hid_p).astype(jnp.float32)

    w2_p = jnp.pad(w2, ((0, out_p - out_features), (0, hid_p - hidden)))
    b2_2d = jnp.pad(b2, (0, out_p - out_features)).reshape(1, out_p).astype(jnp.float32)

    return w1_p, b1_2d, w2_p, b2_2d, out_features


@functools.partial(jax.jit, static_argnames=("out_features", "tm"))
def net_forward(x, w1_p, b1_2d, w2_p, b2_2d, *, out_features, tm=512):
    """x: (B, input_size). Params come from prepare_params()."""
    B, in_features = x.shape
    out_p = w2_p.shape[0]

    # Batch tile: multiple of 8 sublanes; pad batch up to a tile multiple.
    tm = min(tm, _round_up(B, 8))
    Bp = _round_up(B, tm)
    if Bp != B:
        x = jnp.pad(x, ((0, Bp - B), (0, 0)))

    out_padded = pl.pallas_call(
        _mlp_kernel,
        out_shape=jax.ShapeDtypeStruct((Bp, out_p), x.dtype),
        grid=(Bp // tm,),
        in_specs=[
            pl.BlockSpec((tm, in_features), lambda i: (i, 0)),  # x tiled over batch
            pl.BlockSpec(w1_p.shape, lambda i: (0, 0)),         # W1 resident
            pl.BlockSpec(b1_2d.shape, lambda i: (0, 0)),        # b1 resident
            pl.BlockSpec(w2_p.shape, lambda i: (0, 0)),         # W2 (padded) resident
            pl.BlockSpec(b2_2d.shape, lambda i: (0, 0)),        # b2 (padded) resident
        ],
        out_specs=pl.BlockSpec((tm, out_p), lambda i: (i, 0)),
        compiler_params=pltpu.CompilerParams(
            # Independent batch tiles: pipelined DMAs, and sharded across the
            # 2 TensorCores on v7x (no-op on single-TC v5e/v6e).
            dimension_semantics=("parallel",),
        ),
    )(x, w1_p, b1_2d, w2_p, b2_2d)

    return out_padded[:B, :out_features]


if __name__ == "__main__":
    # Shapes consistent with the module: Net(input_size=32, hidden_size=64, output_size=16)
    batch, input_size, hidden_size, output_size = 8, 32, 64, 16

    key = jax.random.PRNGKey(0)
    kx, k1, k2, k3, k4 = jax.random.split(key, 5)

    x = jax.random.normal(kx, (batch, input_size), dtype=jnp.float32)
    # PyTorch nn.Linear parameter shapes: weight (out_features, in_features), bias (out_features,)
    w1 = jax.random.normal(k1, (hidden_size, input_size), dtype=jnp.float32) * 0.1
    b1 = jax.random.normal(k2, (hidden_size,), dtype=jnp.float32) * 0.1
    w2 = jax.random.normal(k3, (output_size, hidden_size), dtype=jnp.float32) * 0.1
    b2 = jax.random.normal(k4, (output_size,), dtype=jnp.float32) * 0.1

    w1_k, b1_k, w2_k, b2_k, out_feats = prepare_params(w1, b1, w2, b2)

    out = net_forward(x, w1_k, b1_k, w2_k, b2_k, out_features=out_feats)
    jax.block_until_ready(out)

    # Pure-JAX reference
    ref = jnp.maximum(x @ w1.T + b1, 0.0) @ w2.T + b2
    assert out.shape == (batch, output_size)
    assert jnp.allclose(out, ref, atol=1e-5, rtol=1e-5), "mismatch vs reference"

    print("KERNEL_OK")
</pallas_src>

<mosaic_0001>
module attributes {stable_mosaic.version = 11 : i64} {
  func.func @_mlp_kernel(%arg0: i32, %arg1: memref<8x32xf32, #tpu.memory_space<vmem>>, %arg2: memref<128x32xf32, #tpu.memory_space<vmem>>, %arg3: memref<1x128xf32, #tpu.memory_space<vmem>>, %arg4: memref<128x128xf32, #tpu.memory_space<vmem>>, %arg5: memref<1x128xf32, #tpu.memory_space<vmem>>, %arg6: memref<8x128xf32, #tpu.memory_space<vmem>>) attributes {dimension_semantics = [#tpu.dimension_semantics<parallel>], iteration_bounds = array<i64: 1>, scalar_prefetch = 0 : i64, scratch_operands = 0 : i64, tpu.core_type = #tpu.core_type<tc>, window_params = [{transform_indices = @transform_0, window_bounds = array<i64: 8, 32>}, {pipeline_mode = #tpu.pipeline_mode<synchronous>, transform_indices = @transform_1, window_bounds = array<i64: 128, 32>}, {pipeline_mode = #tpu.pipeline_mode<synchronous>, transform_indices = @transform_2, window_bounds = array<i64: 1, 128>}, {pipeline_mode = #tpu.pipeline_mode<synchronous>, transform_indices = @transform_3, window_bounds = array<i64: 128, 128>}, {pipeline_mode = #tpu.pipeline_mode<synchronous>, transform_indices = @transform_4, window_bounds = array<i64: 1, 128>}, {transform_indices = @transform_5, window_bounds = array<i64: 8, 128>}]} {
    %c0 = arith.constant 0 : index
    %c0_0 = arith.constant 0 : index
    %0 = vector.load %arg1[%c0, %c0_0] : memref<8x32xf32, #tpu.memory_space<vmem>>, vector<8x32xf32>
    %c0_1 = arith.constant 0 : index
    %c0_2 = arith.constant 0 : index
    %1 = vector.load %arg2[%c0_1, %c0_2] : memref<128x32xf32, #tpu.memory_space<vmem>>, vector<128x32xf32>
    %cst = arith.constant dense<0.000000e+00> : vector<8x128xf32>
    %2 = tpu.matmul %0, %1, %cst {dimension_numbers = #tpu.dot_dimension_numbers<[1], [1], [0], [0], [0, 0, 1, 0], [], []>} : vector<8x32xf32>, vector<128x32xf32>, vector<8x128xf32> -> vector<8x128xf32>
    %c0_3 = arith.constant 0 : index
    %c0_4 = arith.constant 0 : index
    %3 = vector.load %arg3[%c0_3, %c0_4] : memref<1x128xf32, #tpu.memory_space<vmem>>, vector<1x128xf32>
    %4 = vector.broadcast %3 : vector<1x128xf32> to vector<8x128xf32>
    %5 = arith.addf %2, %4 : vector<8x128xf32>
    %cst_5 = arith.constant 0.000000e+00 : f32
    %6 = vector.broadcast %cst_5 : f32 to vector<8x128xf32>
    %7 = arith.maximumf %5, %6 : vector<8x128xf32>
    %c0_6 = arith.constant 0 : index
    %c0_7 = arith.constant 0 : index
    %8 = vector.load %arg4[%c0_6, %c0_7] : memref<128x128xf32, #tpu.memory_space<vmem>>, vector<128x128xf32>
    %cst_8 = arith.constant dense<0.000000e+00> : vector<8x128xf32>
    %9 = tpu.matmul %7, %8, %cst_8 {dimension_numbers = #tpu.dot_dimension_numbers<[1], [1], [0], [0], [0, 0, 1, 0], [], []>} : vector<8x128xf32>, vector<128x128xf32>, vector<8x128xf32> -> vector<8x128xf32>
    %c0_9 = arith.constant 0 : index
    %c0_10 = arith.constant 0 : index
    %10 = vector.load %arg5[%c0_9, %c0_10] : memref<1x128xf32, #tpu.memory_space<vmem>>, vector<1x128xf32>
    %11 = vector.broadcast %10 : vector<1x128xf32> to vector<8x128xf32>
    %12 = arith.addf %9, %11 : vector<8x128xf32>
    %c0_11 = arith.constant 0 : index
    %c0_12 = arith.constant 0 : index
    %13 = vector.load %arg6[%c0_11, %c0_12] : memref<8x128xf32, #tpu.memory_space<vmem>>, vector<8x128xf32>
    tpu.vector_store %arg6[%c0_11, %c0_12], %12 {strides = array<i32>} : memref<8x128xf32, #tpu.memory_space<vmem>>, vector<8x128xf32>,
    return
  }
  func.func @transform_0(%arg0: i32) -> (i32, i32) {
    %c0_i32 = arith.constant 0 : i32
    %c0_i32_0 = arith.constant 0 : i32
    return %arg0, %c0_i32 : i32, i32
  }
  func.func @transform_1(%arg0: i32) -> (i32, i32) {
    %c0_i32 = arith.constant 0 : i32
    %c0_i32_0 = arith.constant 0 : i32
    %c0_i32_1 = arith.constant 0 : i32
    return %c0_i32, %c0_i32_0 : i32, i32
  }
  func.func @transform_2(%arg0: i32) -> (i32, i32) {
    %c0_i32 = arith.constant 0 : i32
    %c0_i32_0 = arith.constant 0 : i32
    %c0_i32_1 = arith.constant 0 : i32
    return %c0_i32, %c0_i32_0 : i32, i32
  }
  func.func @transform_3(%arg0: i32) -> (i32, i32) {
    %c0_i32 = arith.constant 0 : i32
    %c0_i32_0 = arith.constant 0 : i32
    %c0_i32_1 = arith.constant 0 : i32
    return %c0_i32, %c0_i32_0 : i32, i32
  }
  func.func @transform_4(%arg0: i32) -> (i32, i32) {
    %c0_i32 = arith.constant 0 : i32
    %c0_i32_0 = arith.constant 0 : i32
    %c0_i32_1 = arith.constant 0 : i32
    return %c0_i32, %c0_i32_0 : i32, i32
  }
  func.func @transform_5(%arg0: i32) -> (i32, i32) {
    %c0_i32 = arith.constant 0 : i32
    %c0_i32_0 = arith.constant 0 : i32
    return %arg0, %c0_i32 : i32, i32
  }
}

</mosaic_0001>

<bundles_post_ra>
// kernel: net_forward.1
= control target key start
LH: loop header
LB: loop body
LE: loop exit
PB: predicated region body
PF: predicated region fallthrough
CT: control target
= control target key end

     0   :  { %vm45_vm0 = vcmask 261120   ;;  %v483_v2 = vmov 0.0|0.0   ;;  %vm484_vm2 = vmmov 0   ;;  %v485_v5 = vmov 0.0   ;;  %s673_s0 = inlined_call_operand.vmem [shape: f32[8,32], index: 0, kind: input, shape index: {}]   ;;  %s674_s1 = inlined_call_operand.vmem [shape: f32[128,32], index: 1, kind: input, shape index: {}]   ;;  %s675_s2 = inlined_call_operand.vmem [shape: f32[1,128], index: 2, kind: input, shape index: {}]   ;;  %s676_s3 = inlined_call_operand.vmem [shape: f32[128,128], index: 3, kind: input, shape index: {}]   ;;  %s677_s4 = inlined_call_operand.vmem [shape: f32[1,128], index: 4, kind: input, shape index: {}]   ;;  %s678_s5 = inlined_call_operand.hbm [shape: f32[8,128], index: 5, kind: output, shape index: {}]  }
   0x1   :  { %v22_v0 = vld [vmem:[%s674_s1] sm:$0xff]  ;;  %v23_v1 = vld [vmem:[%s674_s1 + $0x8] sm:$0xff]  ;;  %399 = vmatprep.subr.bf16.mxu0 %v483_v2  ;;  %vm526_vm1 = vmpackc.low %vm45_vm0, %vm45_vm0  ;;  %431 = vmatprep.subr.bf16.mxu1 %v483_v2 }
   0x2   :  { %v400_v3 = vpack.c.bf16 %v23_v1, %v22_v0  ;;  %361 = vmatprep.mubr.msk.f32.mxu0 %vm484_vm2, %v485_v5  ;;  %396 = vmatprep.mubr.msk.f32.mxu1 %vm484_vm2, %v485_v5  ;;  %v24_v6 = vld [vmem:[%s674_s1 + $0x10] sm:$0xff]  ;;  %v25_v7 = vld [vmem:[%s674_s1 + $0x18] sm:$0xff]  ;;  %v168_v8 = vld [vmem:[%s676_s3] sm:$0xff] }
   0x3   :  { %v169_v9 = vld [vmem:[%s676_s3 + $0x8] sm:$0xff]  ;;  %v404_v10 = vpack.c.bf16 %v25_v7, %v24_v6  ;;  %v170_v12 = vld [vmem:[%s676_s3 + $0x10] sm:$0xff]  ;;  %v171_v13 = vld [vmem:[%s676_s3 + $0x18] sm:$0xff] }
   0x4   :  { %402 = vmatpush3.bf16.xpose.msk.msra.mxu0 %vm526_vm1, %v400_v3  ;;  %v432_v11 = vpack.c.bf16 %v169_v9, %v168_v8 }
   0x5   :  { %403 = vmatprep.subr.bf16.mxu0 %v483_v2 }
   0x6   :  { %433 = vmatpush3.bf16.xpose.msra.mxu1 %v432_v11 }
   0x7   :  { %434 = vmatprep.subr.bf16.mxu1 %v483_v2 }
   0xc   :  { %406 = vmatpush3.bf16.xpose.msk.msra.mxu0 %vm526_vm1, %v404_v10 }
   0xd   :  { %10 = vsyncpa [#allocation3], 0  ;;  %407 = vmatprep.subr.bf16.mxu0 %v483_v2  ;;  %v26_v14 = vld [vmem:[%s674_s1 + $0x20] sm:$0xff]  ;;  %v27_v15 = vld [vmem:[%s674_s1 + $0x28] sm:$0xff]  ;;  %v435_v16 = vpack.c.bf16 %v171_v13, %v170_v12  ;;  %s486_s11 = smov [#allocation2]  }
   0xe   :  { %v408_v17 = vpack.c.bf16 %v27_v15, %v26_v14  ;;  %v172_v18 = vld [vmem:[%s676_s3 + $0x20] sm:$0xff]  ;;  %v173_v19 = vld [vmem:[%s676_s3 + $0x28] sm:$0xff]  ;;  %v28_v20 = vld [vmem:[%s674_s1 + $0x30] sm:$0xff]  ;;  %s268_s12 = sshll.u32 %s486_s11, 4  ;;  %s269_s12 = int_to_ptr.vmem [resolvable:$true] %s268_s12 }
   0xf   :  { %436 = vmatpush3.bf16.xpose.msra.mxu1 %v435_v16  ;;  %v29_v21 = vld [vmem:[%s674_s1 + $0x38] sm:$0xff]  ;;  %v438_v22 = vpack.c.bf16 %v173_v19, %v172_v18  ;;  %v174_v24 = vld [vmem:[%s676_s3 + $0x30] sm:$0xff]  ;;  %v30_v26 = vld [vmem:[%s674_s1 + $0x40] sm:$0xff]  ;;  %p464_p1 = scmp.lt.s32.totalorder %s269_s12, %s269_s12 }
  0x10   :  { %437 = vmatprep.subr.bf16.mxu1 %v483_v2  ;;  %v412_v23 = vpack.c.bf16 %v29_v21, %v28_v20  ;;  %v175_v25 = vld [vmem:[%s676_s3 + $0x38] sm:$0xff]  ;;  %v31_v27 = vld [vmem:[%s674_s1 + $0x48] sm:$0xff]  ;;  %v176_v30 = vld [vmem:[%s676_s3 + $0x40] sm:$0xff] }
  0x11   :  { %v441_v28 = vpack.c.bf16 %v175_v25, %v174_v24  ;;  %v416_v29 = vpack.c.bf16 %v31_v27, %v30_v26  ;;  %v177_v31 = vld [vmem:[%s676_s3 + $0x48] sm:$0xff]  ;;  %v32_v32 = vld [vmem:[%s674_s1 + $0x50] sm:$0xff]  ;;  %v33_v33 = vld [vmem:[%s674_s1 + $0x58] sm:$0xff] }
  0x12   :  { %v444_v34 = vpack.c.bf16 %v177_v31, %v176_v30  ;;  %v420_v35 = vpack.c.bf16 %v33_v33, %v32_v32  ;;  %v178_v36 = vld [vmem:[%s676_s3 + $0x50] sm:$0xff]  ;;  %v179_v37 = vld [vmem:[%s676_s3 + $0x58] sm:$0xff]  ;;  %v34_v38 = vld [vmem:[%s674_s1 + $0x60] sm:$0xff] }
  0x13   :  { %v35_v39 = vld [vmem:[%s674_s1 + $0x68] sm:$0xff]  ;;  %v447_v40 = vpack.c.bf16 %v179_v37, %v178_v36  ;;  %v180_v42 = vld [vmem:[%s676_s3 + $0x60] sm:$0xff]  ;;  %v36_v44 = vld [vmem:[%s674_s1 + $0x70] sm:$0xff] }
  0x14   :  { %410 = vmatpush3.bf16.xpose.msk.msra.mxu0 %vm526_vm1, %v408_v17  ;;  %v424_v41 = vpack.c.bf16 %v35_v39, %v34_v38  ;;  %v181_v43 = vld [vmem:[%s676_s3 + $0x68] sm:$0xff]  ;;  %v37_v45 = vld [vmem:[%s674_s1 + $0x78] sm:$0xff]  ;;  %v182_v48 = vld [vmem:[%s676_s3 + $0x70] sm:$0xff] }
  0x15   :  { %411 = vmatprep.subr.bf16.mxu0 %v483_v2  ;;  %v450_v46 = vpack.c.bf16 %v181_v43, %v180_v42  ;;  %v428_v47 = vpack.c.bf16 %v37_v45, %v36_v44  ;;  %v183_v49 = vld [vmem:[%s676_s3 + $0x78] sm:$0xff]  ;;  %v21_v51 = vld [vmem:[%s673_s0] sm:$0xff]  ;;  %s459_s0 = scalar_lea.vmem %s269_s12, 128 }
  0x16   :  { %v453_v50 = vpack.c.bf16 %v183_v49, %v182_v48  ;;  %v276_v52 = vld [vmem:[%s675_s2] ss:$0 sm:$0xff]  ;;  %p460_p0 = scmp.ne.s32.totalorder %s269_s12, %s459_s0  ;;  %p465_p2 = scmp.lt.s32.totalorder %s459_s0, %s459_s0 }
  0x17   :  { %439 = vmatpush3.bf16.xpose.msra.mxu1 %v438_v22  ;;  %v294_v57 = vld [vmem:[%s677_s4] ss:$0 sm:$0xff] }
  0x18   :  { %440 = vmatprep.subr.bf16.mxu1 %v483_v2  ;;  %p466_p3 = por %p465_p2, %p464_p1 }
  0x1a   :  { %p467_p4 = pnand %p466_p3, %p460_p0 }
  0x1c   :  { %414 = vmatpush3.bf16.xpose.msk.msra.mxu0 %vm526_vm1, %v412_v23 }
  0x1d   :  { %415 = vmatprep.subr.bf16.mxu0 %v483_v2 }
  0x1f   :  { %442 = vmatpush3.bf16.xpose.msra.mxu1 %v441_v28 }
  0x20   :  { %443 = vmatprep.subr.bf16.mxu1 %v483_v2 }
  0x24   :  { %418 = vmatpush3.bf16.xpose.msk.msra.mxu0 %vm526_vm1, %v416_v29 }
  0x25   :  { %419 = vmatprep.subr.bf16.mxu0 %v483_v2 }
  0x27   :  { %445 = vmatpush3.bf16.xpose.msra.mxu1 %v444_v34 }
  0x28   :  { %446 = vmatprep.subr.bf16.mxu1 %v483_v2 }
  0x2c   :  { %422 = vmatpush3.bf16.xpose.msk.msra.mxu0 %vm526_vm1, %v420_v35 }
  0x2d   :  { %423 = vmatprep.subr.bf16.mxu0 %v483_v2 }
  0x2f   :  { %448 = vmatpush3.bf16.xpose.msra.mxu1 %v447_v40 }
  0x30   :  { %449 = vmatprep.subr.bf16.mxu1 %v483_v2 }
  0x34   :  { %426 = vmatpush3.bf16.xpose.msk.msra.mxu0 %vm526_vm1, %v424_v41 }
  0x35   :  { %427 = vmatprep.subr.bf16.mxu0 %v483_v2 }
  0x37   :  { %451 = vmatpush3.bf16.xpose.msra.mxu1 %v450_v46 }
  0x38   :  { %452 = vmatprep.subr.bf16.mxu1 %v483_v2 }
  0x3c   :  { %430 = vmatpush3.bf16.xpose.msk.msra.mxu0 %vm526_vm1, %v428_v47 }
  0x3f   :  { %454 = vmatpush3.bf16.xpose.msra.mxu1 %v453_v50 }
  0x43   :  { %362 = vmatmul.mubr.msk.f32.vlgmr.msra.gmra.mrb[0].mxu0 %vm45_vm0, %v21_v51 }
 0x116   :  { %v163_v53 = vpop.f32.mrb[0].mxu0 }
 0x117   :  { %v164_v54 = vadd.f32 %v276_v52, %v163_v53  ;;  %v363_v55 = vpop.f32.mrb[1].mxu0 }
 0x119   :  { %v167_v56 = vmax.f32 %v164_v54, 0.0 }
 0x11b   :  { %397 = vmatmul.mubr.f32.vlgmr.msra.gmra.mrb[0].mxu1 %v167_v56 }
 0x1ee   :  { %v257_v58 = vpop.f32.mrb[0].mxu1 }
 0x1ef   :  { %v258_v59 = vadd.f32 %v294_v57, %v257_v58  ;;  %v398_v60 = vpop.f32.mrb[1].mxu1 }
 0x1f1   :  { %261 = vst [vmem:[#allocation2] sm:$0xff] %v258_v59 }
 0x1f2   :  { %470 = shalt.err (!%p467_p4)
}
 0x1f3   :  { %s471_s14 = scalar_lea.hbm %s678_s5, 128 }
 0x1f4   :  { %p472_p5 = scmp.ne.s32.totalorder %s678_s5, %s471_s14  ;;  %p475_p6 = scmp.lt.u32.totalorder %s471_s14, %s678_s5 }
 0x1f6   :  { %p477_p7 = pnand %p475_p6, %p472_p5 }
 0x1f8   :  { %480 = shalt.err (!%p477_p7)
}
 0x1f9   :  { %271 = dma.vmem_to_hbm [thread:$0]  %s269_s12, 128, %s678_s5, [#allocation3]  }
 0x1fa   :  { %481 = dma.done.wait [#allocation3], 128  }
 0x1fb   :  { %482 = vsyncadd [#allocation3], 4294967168 }
 0x1fc   :  { %275 = vsyncpa [#allocation3], 1 }

</bundles_post_ra>
